<compile_context>
chip_gen: v7x
topology: tpu7x:2x2x1
jax: 0.10.0
libtpu: 0.0.40
codegen_flags: <defaults>
</compile_context>

<pallas_src>
import functools

import jax
import jax.numpy as jnp
from jax.experimental import pallas as pl
from jax.experimental.pallas import tpu as pltpu

LANE = 128
SUBL = 8
MAX_BLOCK_ROWS = 2048  # 2048 * 128 * 4 B = 1 MiB per f32 input block


def _cdiv(a, b):
    return -(-a // b)


def _round_up(x, m):
    return ((x + m - 1) // m) * m


def _focal_elementwise(pt, tgt, *, gamma, alpha):
    """Per-element focal loss in f32, minimizing EUP (log/exp) traffic."""
    log_pt = jnp.log(pt)
    log_1mpt = jnp.log(1.0 - pt)
    g = float(gamma)
    if g == 0.0:
        pos = tgt * log_pt
        neg = (1.0 - tgt) * log_1mpt
    elif g.is_integer() and g > 0:
        gi = int(g)
        pos = jax.lax.integer_pow(pt, gi) * tgt * log_pt
        neg = jax.lax.integer_pow(1.0 - pt, gi) * (1.0 - tgt) * log_1mpt
    else:
        # reuse the logs already computed: x**g = exp(g * log(x))
        pos = jnp.exp(g * log_pt) * tgt * log_pt
        neg = jnp.exp(g * log_1mpt) * (1.0 - tgt) * log_1mpt
    return (-alpha) * pos - (1.0 - alpha) * neg


def _focal_reduce_kernel(p_ref, t_ref, out_ref, *, gamma, alpha,
                         n_valid, block_rows, steps_per_shard, need_mask):
    s = pl.program_id(0)   # shard axis ("parallel", megacore-friendly)
    t = pl.program_id(1)   # reduction axis ("arbitrary")

    @pl.when(t == 0)
    def _():
        out_ref[...] = jnp.zeros_like(out_ref)

    pt = p_ref[...].astype(jnp.float32)
    tgt = t_ref[...].astype(jnp.float32)
    loss = _focal_elementwise(pt, tgt, gamma=gamma, alpha=alpha)

    if need_mask:
        blk = s * steps_per_shard + t
        rows = jax.lax.broadcasted_iota(jnp.int32, loss.shape, 0)
        lanes = jax.lax.broadcasted_iota(jnp.int32, loss.shape, 1)
        flat = (blk * block_rows + rows) * LANE + lanes
        loss = jnp.where(flat < n_valid, loss, jnp.float32(0.0))

    # Pure-VPU partial sum into the VMEM-resident (8,128) output block.
    out_ref[...] += loss.reshape(block_rows // SUBL, SUBL, LANE).sum(axis=0)


def _focal_none_kernel(p_ref, t_ref, o_ref, *, gamma, alpha):
    pt = p_ref[...].astype(jnp.float32)
    tgt = t_ref[...].astype(jnp.float32)
    o_ref[...] = _focal_elementwise(pt, tgt, gamma=gamma, alpha=alpha)


def focal_loss(predict, target, *, gamma=0, alpha=0.82, reduction='mean'):
    """Pallas TPU implementation of FocalLoss.forward."""
    assert predict.shape == target.shape
    orig_shape = predict.shape
    n = int(predict.size)

    rows_min = _round_up(_cdiv(n, LANE), SUBL)
    block_rows = min(MAX_BLOCK_ROWS, rows_min)

    def _prep(x, pad_rows, fill):
        # keep original dtype (no wrapper upcast); pad with loss-safe values
        flat = x.reshape(-1)
        pad = pad_rows * LANE - n
        if pad:
            flat = jnp.pad(flat, (0, pad), constant_values=fill)
        return flat.reshape(pad_rows, LANE)

    if reduction in ('mean', 'sum'):
        blocks_min = _cdiv(rows_min, block_rows)
        num_shards = 2 if blocks_min >= 2 else 1   # shard across v7x TCs
        padded_rows = _round_up(rows_min, block_rows * num_shards)
        steps = padded_rows // block_rows // num_shards
        need_mask = (padded_rows * LANE) != n

        p2 = _prep(predict, padded_rows, 0.5)  # finite logs in padding
        t2 = _prep(target, padded_rows, 0)

        kernel = functools.partial(
            _focal_reduce_kernel, gamma=gamma, alpha=alpha, n_valid=n,
            block_rows=block_rows, steps_per_shard=steps, need_mask=need_mask)

        partials = pl.pallas_call(
            kernel,
            out_shape=jax.ShapeDtypeStruct((num_shards * SUBL, LANE),
                                           jnp.float32),
            grid_spec=pltpu.PrefetchScalarGridSpec(
                num_scalar_prefetch=0,
                grid=(num_shards, steps),
                in_specs=[
                    pl.BlockSpec((block_rows, LANE),
                                 lambda s, t: (s * steps + t, 0)),
                    pl.BlockSpec((block_rows, LANE),
                                 lambda s, t: (s * steps + t, 0)),
                ],
                out_specs=pl.BlockSpec((SUBL, LANE), lambda s, t: (s, 0)),
            ),
            compiler_params=pltpu.CompilerParams(
                dimension_semantics=("parallel", "arbitrary")),
        )(p2, t2)

        total = jnp.sum(partials)        # tiny epilogue reduce in the wrapper
        if reduction == 'mean':
            total = total / jnp.float32(n)
        return total

    else:  # reduction == 'none'
        padded_rows = _round_up(rows_min, block_rows)
        grid = (padded_rows // block_rows,)
        p2 = _prep(predict, padded_rows, 0.5)
        t2 = _prep(target, padded_rows, 0)

        kernel = functools.partial(_focal_none_kernel, gamma=gamma, alpha=alpha)
        out = pl.pallas_call(
            kernel,
            out_shape=jax.ShapeDtypeStruct((padded_rows, LANE), jnp.float32),
            grid_spec=pltpu.PrefetchScalarGridSpec(
                num_scalar_prefetch=0,
                grid=grid,
                in_specs=[
                    pl.BlockSpec((block_rows, LANE), lambda i: (i, 0)),
                    pl.BlockSpec((block_rows, LANE), lambda i: (i, 0)),
                ],
                out_specs=pl.BlockSpec((block_rows, LANE), lambda i: (i, 0)),
            ),
            compiler_params=pltpu.CompilerParams(
                dimension_semantics=("parallel",)),
        )(p2, t2)
        return out.reshape(-1)[:n].reshape(orig_shape)


def focal_loss_ref(predict, target, *, gamma=0, alpha=0.82, reduction='mean'):
    """Pure-JAX reference mirroring the PyTorch forward."""
    pt = predict.astype(jnp.float32)
    tgt = target.astype(jnp.float32)
    loss = (-alpha * pt ** gamma * tgt * jnp.log(pt)
            - (1.0 - alpha) * (1.0 - pt) ** gamma * (1.0 - tgt)
            * jnp.log(1.0 - pt))
    if reduction == 'mean':
        return jnp.mean(loss)
    elif reduction == 'sum':
        return jnp.sum(loss)
    return loss


if __name__ == "__main__":
    key = jax.random.PRNGKey(0)
    k_p, k_t, k_p2, k_t2 = jax.random.split(key, 4)

    # predict: probabilities in (eps, 1-eps) so log() is finite, as the
    # module implicitly assumes sigmoid/softmax outputs.
    shape = (2, 4, 16, 16)
    predict = jax.random.uniform(k_p, shape, jnp.float32,
                                 minval=1e-4, maxval=1.0 - 1e-4)
    target = jax.random.bernoulli(k_t, 0.3, shape).astype(jnp.float32)

    # mean, gamma=0 (module defaults)
    out = focal_loss(predict, target, gamma=0, alpha=0.82, reduction='mean')
    out = jax.block_until_ready(out)
    ref = focal_loss_ref(predict, target, gamma=0, alpha=0.82,
                         reduction='mean')
    assert jnp.allclose(out, ref, rtol=1e-5, atol=1e-5), (out, ref)

    # sum, gamma=2 (integer-pow path)
    out_s = focal_loss(predict, target, gamma=2, alpha=0.82, reduction='sum')
    out_s = jax.block_until_ready(out_s)
    ref_s = focal_loss_ref(predict, target, gamma=2, alpha=0.82,
                           reduction='sum')
    assert jnp.allclose(out_s, ref_s, rtol=1e-4, atol=1e-4), (out_s, ref_s)

    # 'none' + ragged shape (exercises padding/mask + tail slice)
    shape2 = (3, 5, 7)
    p2 = jax.random.uniform(k_p2, shape2, jnp.float32,
                            minval=1e-4, maxval=1.0 - 1e-4)
    t2 = jax.random.bernoulli(k_t2, 0.3, shape2).astype(jnp.float32)
    out_n = focal_loss(p2, t2, gamma=0, alpha=0.82, reduction='none')
    out_n = jax.block_until_ready(out_n)
    ref_n = focal_loss_ref(p2, t2, gamma=0, alpha=0.82, reduction='none')
    assert jnp.allclose(out_n, ref_n, rtol=1e-5, atol=1e-5)

    out_m = focal_loss(p2, t2, gamma=0, alpha=0.82, reduction='mean')
    out_m = jax.block_until_ready(out_m)
    ref_m = focal_loss_ref(p2, t2, gamma=0, alpha=0.82, reduction='mean')
    assert jnp.allclose(out_m, ref_m, rtol=1e-5, atol=1e-5), (out_m, ref_m)

    print("KERNEL_OK")
</pallas_src>

<mosaic_0001>
module attributes {stable_mosaic.version = 11 : i64} {
  func.func @_focal_reduce_kernel(%arg0: i32, %arg1: i32, %arg2: memref<16x128xf32, #tpu.memory_space<vmem>>, %arg3: memref<16x128xf32, #tpu.memory_space<vmem>>, %arg4: memref<8x128xf32, #tpu.memory_space<vmem>>) attributes {dimension_semantics = [#tpu.dimension_semantics<parallel>, #tpu.dimension_semantics<arbitrary>], iteration_bounds = array<i64: 1, 1>, scalar_prefetch = 0 : i64, scratch_operands = 0 : i64, tpu.core_type = #tpu.core_type<tc>, window_params = [{transform_indices = @transform_0, window_bounds = array<i64: 16, 128>}, {transform_indices = @transform_1, window_bounds = array<i64: 16, 128>}, {transform_indices = @transform_2, window_bounds = array<i64: 8, 128>}]} {
    %c0_i32 = arith.constant 0 : i32
    %0 = arith.cmpi eq, %arg1, %c0_i32 : i32
    %1 = arith.extui %0 : i1 to i32
    %c0_i32_0 = arith.constant 0 : i32
    %2 = arith.cmpi ne, %1, %c0_i32_0 : i32
    scf.if %2 {
      %cst_12 = arith.constant 0.000000e+00 : f32
      %23 = vector.broadcast %cst_12 : f32 to vector<8x128xf32>
      %c0_13 = arith.constant 0 : index
      %c0_14 = arith.constant 0 : index
      %24 = vector.load %arg4[%c0_13, %c0_14] : memref<8x128xf32, #tpu.memory_space<vmem>>, vector<8x128xf32>
      tpu.vector_store %arg4[%c0_13, %c0_14], %23 {strides = array<i32>} : memref<8x128xf32, #tpu.memory_space<vmem>>, vector<8x128xf32>,
    } else {
    }
    %c0 = arith.constant 0 : index
    %c0_1 = arith.constant 0 : index
    %3 = vector.load %arg2[%c0, %c0_1] : memref<16x128xf32, #tpu.memory_space<vmem>>, vector<16x128xf32>
    %c0_2 = arith.constant 0 : index
    %c0_3 = arith.constant 0 : index
    %4 = vector.load %arg3[%c0_2, %c0_3] : memref<16x128xf32, #tpu.memory_space<vmem>>, vector<16x128xf32>
    %5 = math.log %3 : vector<16x128xf32>
    %cst = arith.constant 1.000000e+00 : f32
    %6 = vector.broadcast %cst : f32 to vector<16x128xf32>
    %7 = arith.subf %6, %3 : vector<16x128xf32>
    %8 = math.log %7 : vector<16x128xf32>
    %9 = arith.mulf %4, %5 : vector<16x128xf32>
    %cst_4 = arith.constant 1.000000e+00 : f32
    %10 = vector.broadcast %cst_4 : f32 to vector<16x128xf32>
    %11 = arith.subf %10, %4 : vector<16x128xf32>
    %12 = arith.mulf %11, %8 : vector<16x128xf32>
    %cst_5 = arith.constant -0.819999992 : f32
    %13 = vector.broadcast %cst_5 : f32 to vector<16x128xf32>
    %14 = arith.mulf %13, %9 : vector<16x128xf32>
    %cst_6 = arith.constant 1.800000e-01 : f32
    %15 = vector.broadcast %cst_6 : f32 to vector<16x128xf32>
    %16 = arith.mulf %15, %12 : vector<16x128xf32>
    %17 = arith.subf %14, %16 : vector<16x128xf32>
    %c0_7 = arith.constant 0 : index
    %c0_8 = arith.constant 0 : index
    %18 = vector.load %arg4[%c0_7, %c0_8] : memref<8x128xf32, #tpu.memory_space<vmem>>, vector<8x128xf32>
    %19 = vector.shape_cast %17 : vector<16x128xf32> to vector<2x8x128xf32>
    %cst_9 = arith.constant dense<0.000000e+00> : vector<8x128xf32>
    %20 = vector.multi_reduction <add>, %19, %cst_9 [0] : vector<2x8x128xf32> to vector<8x128xf32>
    %21 = arith.addf %18, %20 : vector<8x128xf32>
    %c0_10 = arith.constant 0 : index
    %c0_11 = arith.constant 0 : index
    %22 = vector.load %arg4[%c0_10, %c0_11] : memref<8x128xf32, #tpu.memory_space<vmem>>, vector<8x128xf32>
    tpu.vector_store %arg4[%c0_10, %c0_11], %21 {strides = array<i32>} : memref<8x128xf32, #tpu.memory_space<vmem>>, vector<8x128xf32>,
    return
  }
  func.func @transform_0(%arg0: i32, %arg1: i32) -> (i32, i32) {
    %c1_i32 = arith.constant 1 : i32
    %0 = arith.muli %arg0, %c1_i32 : i32
    %1 = arith.addi %0, %arg1 : i32
    %c0_i32 = arith.constant 0 : i32
    %c0_i32_0 = arith.constant 0 : i32
    return %1, %c0_i32 : i32, i32
  }
  func.func @transform_1(%arg0: i32, %arg1: i32) -> (i32, i32) {
    %c1_i32 = arith.constant 1 : i32
    %0 = arith.muli %arg0, %c1_i32 : i32
    %1 = arith.addi %0, %arg1 : i32
    %c0_i32 = arith.constant 0 : i32
    %c0_i32_0 = arith.constant 0 : i32
    return %1, %c0_i32 : i32, i32
  }
  func.func @transform_2(%arg0: i32, %arg1: i32) -> (i32, i32) {
    %c0_i32 = arith.constant 0 : i32
    %c0_i32_0 = arith.constant 0 : i32
    return %arg0, %c0_i32 : i32, i32
  }
}

</mosaic_0001>

<bundles_post_ra>
// kernel: tpu_custom_call.1
= control target key start
LH: loop header
LB: loop body
LE: loop exit
PB: predicated region body
PF: predicated region fallthrough
CT: control target
= control target key end

     0   :  { %7 = vsyncpa [#allocation3], 0  ;;  %s245_s0 = inlined_call_operand.hbm [shape: f32[16,128], index: 0, kind: input, shape index: {}]   ;;  %s246_s1 = inlined_call_operand.hbm [shape: f32[16,128], index: 1, kind: input, shape index: {}]   ;;  %s247_s2 = inlined_call_operand.hbm [shape: f32[8,128], index: 2, kind: output, shape index: {}]  }
   0x1   :  { %8 = vsyncpa [#allocation6], 0 }
   0x2   :  { %9 = vsyncpa [#allocation4], 0  ;;  %s189_s9 = smov [#allocation2]   ;;  %s117_s13 = scalar_lea.hbm %s245_s0, 256 }
   0x3   :  { %s19_s10 = sshll.u32 %s189_s9, 4  ;;  %p118_p0 = scmp.ne.s32.totalorder %s245_s0, %s117_s13  ;;  %s20_s10 = int_to_ptr.vmem [resolvable:$true] %s19_s10 }
   0x4   :  { %p121_p1 = scmp.lt.u32.totalorder %s117_s13, %s245_s0 }
   0x6   :  { %p123_p2 = pnand %p121_p1, %p118_p0 }
   0x8   :  { %126 = shalt.err (!%p123_p2)
}
   0x9   :  { %s127_s18 = scalar_lea.vmem %s20_s10, 256  ;;  %p132_p4 = scmp.lt.s32.totalorder %s20_s10, %s20_s10 }
   0xa   :  { %p128_p3 = scmp.ne.s32.totalorder %s20_s10, %s127_s18  ;;  %p133_p5 = scmp.lt.s32.totalorder %s127_s18, %s127_s18 }
   0xc   :  { %p134_p6 = por %p133_p5, %p132_p4 }
   0xe   :  { %p135_p7 = pnand %p134_p6, %p128_p3 }
  0x10   :  { %138 = shalt.err (!%p135_p7)
}
  0x11   :  { %s190_s19 = smov 128   ;;  %s191_s20 = smov 8  }
  0x12   :  { %25 = dma.hbm_to_vmem [thread:$0]  %s245_s0, 256, %s20_s10, [#allocation3], %s190_s19, %s190_s19, %s191_s20  }
  0x13   :  { %s192_s23 = smov [#allocation5]   ;;  %s139_s27 = scalar_lea.hbm %s246_s1, 256 }
  0x14   :  { %s35_s24 = sshll.u32 %s192_s23, 4  ;;  %p140_p8 = scmp.ne.s32.totalorder %s246_s1, %s139_s27  ;;  %s36_s24 = int_to_ptr.vmem [resolvable:$true] %s35_s24 }
  0x15   :  { %p143_p9 = scmp.lt.u32.totalorder %s139_s27, %s246_s1 }
  0x17   :  { %p145_p10 = pnand %p143_p9, %p140_p8 }
  0x19   :  { %148 = shalt.err (!%p145_p10)
}
  0x1a   :  { %s149_s4 = scalar_lea.vmem %s36_s24, 256  ;;  %p154_p12 = scmp.lt.s32.totalorder %s36_s24, %s36_s24 }
  0x1b   :  { %p150_p11 = scmp.ne.s32.totalorder %s36_s24, %s149_s4  ;;  %p155_p13 = scmp.lt.s32.totalorder %s149_s4, %s149_s4 }
  0x1d   :  { %p156_p0 = por %p155_p13, %p154_p12 }
  0x1f   :  { %p157_p1 = pnand %p156_p0, %p150_p11 }
  0x21   :  { %160 = shalt.err (!%p157_p1)
}
  0x22   :  { %41 = dma.hbm_to_vmem [thread:$0]  %s246_s1, 256, %s36_s24, [#allocation6], %s190_s19, %s190_s19, %s191_s20  }
  0x23   :  { %183 = dma.done.wait [#allocation3], 256  }
  0x24   :  { %184 = vsyncadd [#allocation3], 4294967040 }
  0x25   :  { %185 = dma.done.wait [#allocation6], 256  }
  0x26   :  { %186 = vsyncadd [#allocation6], 4294967040  ;;  %v57_v0 = vld [vmem:[#allocation2] sm:$0xff]  ;;  %v58_v1 = vld [vmem:[#allocation2 + $0x8] sm:$0xff]  ;;  %s193_s1 = smov [#allocation7]  }
  0x27   :  { %109 = vlog2.f32 %v57_v0  ;;  %v65_v2 = vsub.f32 1.0, %v57_v0  ;;  %v66_v3 = vsub.f32 1.0, %v58_v1  ;;  %v59_v4 = vld [vmem:[#allocation5] sm:$0xff]  ;;  %v60_v5 = vld [vmem:[#allocation5 + $0x8] sm:$0xff]  ;;  %s93_s6 = sshll.u32 %s193_s1, 4  ;;  %s94_s6 = int_to_ptr.vmem [resolvable:$true] %s93_s6 }
  0x28   :  { %111 = vlog2.f32 %v58_v1  ;;  %v73_v9 = vsub.f32 1.0, %v59_v4  ;;  %v74_v12 = vsub.f32 1.0, %v60_v5  ;;  %s161_s7 = scalar_lea.vmem %s94_s6, 128  ;;  %p166_p3 = scmp.lt.s32.totalorder %s94_s6, %s94_s6 }
  0x29   :  { %113 = vlog2.f32 %v65_v2  ;;  %p162_p2 = scmp.ne.s32.totalorder %s94_s6, %s161_s7  ;;  %p167_p4 = scmp.lt.s32.totalorder %s161_s7, %s161_s7 }
  0x2a   :  { %115 = vlog2.f32 %v66_v3 }
  0x2b   :  { %p168_p5 = por %p167_p4, %p166_p3 }
  0x2d   :  { %p169_p6 = pnand %p168_p5, %p162_p2 }
  0x31   :  { %v110_v6 = vpop.eup %109 }
  0x32   :  { %v112_v7 = vpop.eup %111  ;;  %v62_v8 = vmul.f32 0.6931472, %v110_v6 }
  0x33   :  { %v114_v10 = vpop.eup %113  ;;  %v64_v11 = vmul.f32 0.6931472, %v112_v7 }
  0x34   :  { %v116_v13 = vpop.eup %115  ;;  %v68_v14 = vmul.f32 0.6931472, %v114_v10  ;;  %v71_v15 = vmul.f32 %v62_v8, %v59_v4 }
  0x35   :  { %v70_v16 = vmul.f32 0.6931472, %v116_v13  ;;  %v72_v17 = vmul.f32 %v64_v11, %v60_v5 }
  0x36   :  { %v75_v18 = vmul.f32 %v73_v9, %v68_v14  ;;  %v77_v19 = vmul.f32 -0.82, %v71_v15 }
  0x37   :  { %v76_v20 = vmul.f32 %v74_v12, %v70_v16  ;;  %v78_v21 = vmul.f32 -0.82, %v72_v17 }
  0x38   :  { %v79_v22 = vmul.f32 0.18, %v75_v18 }
  0x39   :  { %v80_v23 = vmul.f32 0.18, %v76_v20 }
  0x3a   :  { %v81_v24 = vsub.f32 %v77_v19, %v79_v22 }
  0x3b   :  { %v82_v25 = vsub.f32 %v78_v21, %v80_v23 }
  0x3d   :  { %v84_v26 = vadd.f32 %v82_v25, %v81_v24 }
  0x3f   :  { %86 = vst [vmem:[#allocation7] sm:$0xff] %v84_v26 }
  0x40   :  { %172 = shalt.err (!%p169_p6)
}
  0x41   :  { %s173_s10 = scalar_lea.hbm %s247_s2, 128 }
  0x42   :  { %p174_p7 = scmp.ne.s32.totalorder %s247_s2, %s173_s10  ;;  %p177_p8 = scmp.lt.u32.totalorder %s173_s10, %s247_s2 }
  0x44   :  { %p179_p9 = pnand %p177_p8, %p174_p7 }
  0x46   :  { %182 = shalt.err (!%p179_p9)
}
  0x47   :  { %96 = dma.vmem_to_hbm [thread:$0]  %s94_s6, 128, %s247_s2, [#allocation4]  }
  0x48   :  { %187 = dma.done.wait [#allocation4], 128  }
  0x49   :  { %188 = vsyncadd [#allocation4], 4294967168 }
  0x4a   :  { %100 = vsyncpa [#allocation3], 1 }
  0x4b   :  { %101 = vsyncpa [#allocation6], 1 }
  0x4c   :  { %102 = vsyncpa [#allocation4], 1 }

</bundles_post_ra>
